<compile_context>
chip_gen: v5e
topology: v5e:2x2
jax: 0.10.0
libtpu: 0.0.40
codegen_flags: <defaults>
</compile_context>

<pallas_src>
import functools

import jax
import jax.numpy as jnp
from jax import lax
from jax.experimental import pallas as pl
from jax.experimental.pallas import tpu as pltpu


def _attention_kernel(x_ref, w_ref, o_ref, *, num_heads):
    # x_ref : (Bt, N, C) bf16 — a block of batch rows
    # w_ref : (C, 3C)    bf16 — fused [Q|K|V] weights, Q columns pre-scaled
    # o_ref : (Bt, N, C) f32  — final output layout (no external transpose)
    Bt, N, C = x_ref.shape
    head_dim = C // num_heads

    # Fused QKV projection for all rows in the block and all heads at once:
    # (Bt*N, C) @ (C, 3C) -> (Bt*N, 3C); bf16 MXU inputs, f32 accumulation.
    x2d = x_ref[...].reshape(Bt * N, C)
    qkv = jnp.dot(x2d, w_ref[...], preferred_element_type=jnp.float32)

    # Contract the last dims of q and k => q @ k^T without an XLU transpose.
    dn = (((1,), (1,)), ((), ()))

    # Bt and num_heads are small static constants: the Python loops unroll
    # into straight-line code with static slices; each head's result is stored
    # immediately (releases live ranges, no concatenate / extra (N, C) copy).
    for b in range(Bt):
        rows = slice(b * N, (b + 1) * N)
        for h in range(num_heads):
            lo = h * head_dim
            hi = lo + head_dim
            qh = qkv[rows, 0 * C + lo:0 * C + hi].astype(jnp.bfloat16)  # (N, Dh)
            kh = qkv[rows, 1 * C + lo:1 * C + hi].astype(jnp.bfloat16)
            vh = qkv[rows, 2 * C + lo:2 * C + hi].astype(jnp.bfloat16)

            # Scores: scale already folded into Q columns of the weight slab.
            s = lax.dot_general(qh, kh, dn,
                                preferred_element_type=jnp.float32)     # (N, N)
            s = s - jnp.max(s, axis=-1, keepdims=True)
            p = jnp.exp(s)
            p = p / jnp.sum(p, axis=-1, keepdims=True)   # exact divide (rows sum to 1)

            oh = jnp.dot(p.astype(jnp.bfloat16), vh,
                         preferred_element_type=jnp.float32)            # (N, Dh)
            o_ref[b, :, lo:hi] = oh.astype(o_ref.dtype)


def attention_forward(x, w_qkv, num_heads, *, block_b=None):
    """Pallas implementation of Attention.forward (eval mode).

    x:      (B, N, C) float32
    w_qkv:  (3*C, C)  float32  — PyTorch nn.Linear(dim, 3*dim, bias=False).weight
    """
    B, N, C = x.shape
    assert C % num_heads == 0
    head_dim = C // num_heads
    scale = head_dim ** (-0.5)

    # PyTorch: qkv = x @ w_qkv.T -> (B, N, 3C) split as (3, H, Dh) on the last
    # dim.  Pre-transpose once, fold 1/sqrt(Dh) into the Q columns, cast to
    # bf16 for the MXU (halves weight DMA bytes too).
    w_t = w_qkv.T                                                  # (C, 3C) = [Q|K|V]
    w_all = jnp.concatenate([w_t[:, :C] * scale, w_t[:, C:]],
                            axis=1).astype(jnp.bfloat16)           # (C, 3C)
    x_bf = x.astype(jnp.bfloat16)

    # Block several batch rows per grid step to amortize per-step overhead.
    if block_b is None:
        block_b = B if B <= 8 else 8
    while B % block_b:           # keep the grid exact (no padded blocks)
        block_b -= 1

    kernel = functools.partial(_attention_kernel, num_heads=num_heads)

    return pl.pallas_call(
        kernel,
        out_shape=jax.ShapeDtypeStruct((B, N, C), x.dtype),
        grid_spec=pltpu.PrefetchScalarGridSpec(
            num_scalar_prefetch=0,
            grid=(B // block_b,),
            in_specs=[
                # x: one batch block per step
                pl.BlockSpec((block_b, N, C), lambda i: (i, 0, 0)),
                # fused weights: constant block index, single-buffered
                pl.BlockSpec((C, 3 * C), lambda i: (0, 0),
                             pipeline_mode=pl.Buffered(1)),
            ],
            out_specs=pl.BlockSpec((block_b, N, C), lambda i: (i, 0, 0)),
        ),
        compiler_params=pltpu.CompilerParams(
            dimension_semantics=("parallel",),        # batch blocks split across TCs
            vmem_limit_bytes=64 * 1024 * 1024,        # explicit scoped-VMEM budget
        ),
    )(x_bf, w_all)


def attention_reference(x, w_qkv, num_heads):
    """Pure-JAX f32 reference mirroring the PyTorch forward (eval mode)."""
    B, N, C = x.shape
    head_dim = C // num_heads
    scale = head_dim ** (-0.5)
    qkv = x @ w_qkv.T                                              # (B, N, 3C)
    qkv = qkv.reshape(B, N, 3, num_heads, head_dim).transpose(2, 0, 3, 1, 4)
    q, k, v = qkv[0], qkv[1], qkv[2]                               # (B, H, N, Dh)
    attn = jnp.einsum('bhqd,bhkd->bhqk', q, k) * scale
    attn = jax.nn.softmax(attn, axis=-1)
    out = jnp.einsum('bhqk,bhkd->bhqd', attn, v)
    return out.transpose(0, 2, 1, 3).reshape(B, N, C)


if __name__ == "__main__":
    key = jax.random.PRNGKey(0)
    kx, kw = jax.random.split(key)

    B, N, C = 2, 8, 32
    num_heads = 4

    x = jax.random.normal(kx, (B, N, C), dtype=jnp.float32)
    # Deterministic init for nn.Linear(dim, 3*dim, bias=False).weight: (3C, C).
    bound = 1.0 / (C ** 0.5)
    w_qkv = jax.random.uniform(kw, (3 * C, C), dtype=jnp.float32,
                               minval=-bound, maxval=bound)

    out = attention_forward(x, w_qkv, num_heads)
    out = jax.block_until_ready(out)

    ref = attention_reference(x, w_qkv, num_heads)
    assert out.shape == (B, N, C)
    # Tolerance accounts for bf16 MXU operands (softmax itself is exact f32
    # with an exact divide); measured error is ~1e-2 absolute worst-case.
    assert jnp.allclose(out, ref, atol=2e-2, rtol=2e-2), "mismatch vs reference"

    print("KERNEL_OK")
</pallas_src>

<mosaic_0001>
module attributes {stable_mosaic.version = 11 : i64} {
  func.func @_attention_kernel(%arg0: i32, %arg1: memref<2x8x32xbf16, #tpu.memory_space<vmem>>, %arg2: memref<32x96xbf16, #tpu.memory_space<vmem>>, %arg3: memref<2x8x32xf32, #tpu.memory_space<vmem>>) attributes {dimension_semantics = [#tpu.dimension_semantics<parallel>], iteration_bounds = array<i64: 1>, scalar_prefetch = 0 : i64, scratch_operands = 0 : i64, tpu.core_type = #tpu.core_type<tc>, window_params = [{transform_indices = @transform_0, window_bounds = array<i64: 2, 8, 32>}, {pipeline_mode = #tpu.pipeline_mode<synchronous>, transform_indices = @transform_1, window_bounds = array<i64: 32, 96>}, {transform_indices = @transform_2, window_bounds = array<i64: 2, 8, 32>}]} {
    %c0 = arith.constant 0 : index
    %c0_0 = arith.constant 0 : index
    %c0_1 = arith.constant 0 : index
    %0 = vector.load %arg1[%c0, %c0_0, %c0_1] : memref<2x8x32xbf16, #tpu.memory_space<vmem>>, vector<2x8x32xbf16>
    %1 = vector.shape_cast %0 : vector<2x8x32xbf16> to vector<16x32xbf16>
    %c0_2 = arith.constant 0 : index
    %c0_3 = arith.constant 0 : index
    %2 = vector.load %arg2[%c0_2, %c0_3] : memref<32x96xbf16, #tpu.memory_space<vmem>>, vector<32x96xbf16>
    %cst = arith.constant dense<0.000000e+00> : vector<16x96xf32>
    %3 = tpu.matmul %1, %2, %cst {dimension_numbers = #tpu.dot_dimension_numbers<[1], [0], [0], [1], [0, 0, 1, 1], [], []>} : vector<16x32xbf16>, vector<32x96xbf16>, vector<16x96xf32> -> vector<16x96xf32>
    %4 = vector.extract_strided_slice %3 {offsets = [0, 0], sizes = [8, 8], strides = [1, 1]} : vector<16x96xf32> to vector<8x8xf32>
    %5 = arith.truncf %4 : vector<8x8xf32> to vector<8x8xbf16>
    %6 = vector.extract_strided_slice %3 {offsets = [0, 32], sizes = [8, 8], strides = [1, 1]} : vector<16x96xf32> to vector<8x8xf32>
    %7 = arith.truncf %6 : vector<8x8xf32> to vector<8x8xbf16>
    %8 = vector.extract_strided_slice %3 {offsets = [0, 64], sizes = [8, 8], strides = [1, 1]} : vector<16x96xf32> to vector<8x8xf32>
    %9 = arith.truncf %8 : vector<8x8xf32> to vector<8x8xbf16>
    %cst_4 = arith.constant dense<0.000000e+00> : vector<8x8xf32>
    %10 = tpu.matmul %5, %7, %cst_4 {dimension_numbers = #tpu.dot_dimension_numbers<[1], [1], [0], [0], [0, 0, 1, 0], [], []>} : vector<8x8xbf16>, vector<8x8xbf16>, vector<8x8xf32> -> vector<8x8xf32>
    %cst_5 = arith.constant dense<0xFF800000> : vector<8xf32>
    %11 = vector.multi_reduction <maximumf>, %10, %cst_5 [1] : vector<8x8xf32> to vector<8xf32>
    %12 = vector.shape_cast %11 : vector<8xf32> to vector<8x1xf32>
    %13 = vector.broadcast %12 : vector<8x1xf32> to vector<8x8xf32>
    %14 = arith.subf %10, %13 : vector<8x8xf32>
    %15 = math.exp %14 : vector<8x8xf32>
    %cst_6 = arith.constant dense<0.000000e+00> : vector<8xf32>
    %16 = vector.multi_reduction <add>, %15, %cst_6 [1] : vector<8x8xf32> to vector<8xf32>
    %17 = vector.shape_cast %16 : vector<8xf32> to vector<8x1xf32>
    %18 = vector.broadcast %17 : vector<8x1xf32> to vector<8x8xf32>
    %19 = arith.divf %15, %18 : vector<8x8xf32>
    %20 = arith.truncf %19 : vector<8x8xf32> to vector<8x8xbf16>
    %cst_7 = arith.constant dense<0.000000e+00> : vector<8x8xf32>
    %21 = tpu.matmul %20, %9, %cst_7 {dimension_numbers = #tpu.dot_dimension_numbers<[1], [0], [0], [1], [0, 0, 1, 1], [], []>} : vector<8x8xbf16>, vector<8x8xbf16>, vector<8x8xf32> -> vector<8x8xf32>
    %c0_8 = arith.constant 0 : index
    %c0_9 = arith.constant 0 : index
    %c0_10 = arith.constant 0 : index
    %22 = vector.load %arg3[%c0_8, %c0_9, %c0_10] : memref<2x8x32xf32, #tpu.memory_space<vmem>>, vector<1x8x8xf32>
    %23 = vector.shape_cast %22 : vector<1x8x8xf32> to vector<8x8xf32>
    %24 = vector.shape_cast %21 : vector<8x8xf32> to vector<1x8x8xf32>
    tpu.vector_store %arg3[%c0_8, %c0_9, %c0_10], %24 {strides = array<i32>} : memref<2x8x32xf32, #tpu.memory_space<vmem>>, vector<1x8x8xf32>,
    %25 = vector.extract_strided_slice %3 {offsets = [0, 8], sizes = [8, 8], strides = [1, 1]} : vector<16x96xf32> to vector<8x8xf32>
    %26 = arith.truncf %25 : vector<8x8xf32> to vector<8x8xbf16>
    %27 = vector.extract_strided_slice %3 {offsets = [0, 40], sizes = [8, 8], strides = [1, 1]} : vector<16x96xf32> to vector<8x8xf32>
    %28 = arith.truncf %27 : vector<8x8xf32> to vector<8x8xbf16>
    %29 = vector.extract_strided_slice %3 {offsets = [0, 72], sizes = [8, 8], strides = [1, 1]} : vector<16x96xf32> to vector<8x8xf32>
    %30 = arith.truncf %29 : vector<8x8xf32> to vector<8x8xbf16>
    %cst_11 = arith.constant dense<0.000000e+00> : vector<8x8xf32>
    %31 = tpu.matmul %26, %28, %cst_11 {dimension_numbers = #tpu.dot_dimension_numbers<[1], [1], [0], [0], [0, 0, 1, 0], [], []>} : vector<8x8xbf16>, vector<8x8xbf16>, vector<8x8xf32> -> vector<8x8xf32>
    %cst_12 = arith.constant dense<0xFF800000> : vector<8xf32>
    %32 = vector.multi_reduction <maximumf>, %31, %cst_12 [1] : vector<8x8xf32> to vector<8xf32>
    %33 = vector.shape_cast %32 : vector<8xf32> to vector<8x1xf32>
    %34 = vector.broadcast %33 : vector<8x1xf32> to vector<8x8xf32>
    %35 = arith.subf %31, %34 : vector<8x8xf32>
    %36 = math.exp %35 : vector<8x8xf32>
    %cst_13 = arith.constant dense<0.000000e+00> : vector<8xf32>
    %37 = vector.multi_reduction <add>, %36, %cst_13 [1] : vector<8x8xf32> to vector<8xf32>
    %38 = vector.shape_cast %37 : vector<8xf32> to vector<8x1xf32>
    %39 = vector.broadcast %38 : vector<8x1xf32> to vector<8x8xf32>
    %40 = arith.divf %36, %39 : vector<8x8xf32>
    %41 = arith.truncf %40 : vector<8x8xf32> to vector<8x8xbf16>
    %cst_14 = arith.constant dense<0.000000e+00> : vector<8x8xf32>
    %42 = tpu.matmul %41, %30, %cst_14 {dimension_numbers = #tpu.dot_dimension_numbers<[1], [0], [0], [1], [0, 0, 1, 1], [], []>} : vector<8x8xbf16>, vector<8x8xbf16>, vector<8x8xf32> -> vector<8x8xf32>
    %c0_15 = arith.constant 0 : index
    %c0_16 = arith.constant 0 : index
    %c8 = arith.constant 8 : index
    %43 = vector.load %arg3[%c0_15, %c0_16, %c8] : memref<2x8x32xf32, #tpu.memory_space<vmem>>, vector<1x8x8xf32>
    %44 = vector.shape_cast %43 : vector<1x8x8xf32> to vector<8x8xf32>
    %45 = vector.shape_cast %42 : vector<8x8xf32> to vector<1x8x8xf32>
    tpu.vector_store %arg3[%c0_15, %c0_16, %c8], %45 {strides = array<i32>} : memref<2x8x32xf32, #tpu.memory_space<vmem>>, vector<1x8x8xf32>,
    %46 = vector.extract_strided_slice %3 {offsets = [0, 16], sizes = [8, 8], strides = [1, 1]} : vector<16x96xf32> to vector<8x8xf32>
    %47 = arith.truncf %46 : vector<8x8xf32> to vector<8x8xbf16>
    %48 = vector.extract_strided_slice %3 {offsets = [0, 48], sizes = [8, 8], strides = [1, 1]} : vector<16x96xf32> to vector<8x8xf32>
    %49 = arith.truncf %48 : vector<8x8xf32> to vector<8x8xbf16>
    %50 = vector.extract_strided_slice %3 {offsets = [0, 80], sizes = [8, 8], strides = [1, 1]} : vector<16x96xf32> to vector<8x8xf32>
    %51 = arith.truncf %50 : vector<8x8xf32> to vector<8x8xbf16>
    %cst_17 = arith.constant dense<0.000000e+00> : vector<8x8xf32>
    %52 = tpu.matmul %47, %49, %cst_17 {dimension_numbers = #tpu.dot_dimension_numbers<[1], [1], [0], [0], [0, 0, 1, 0], [], []>} : vector<8x8xbf16>, vector<8x8xbf16>, vector<8x8xf32> -> vector<8x8xf32>
    %cst_18 = arith.constant dense<0xFF800000> : vector<8xf32>
    %53 = vector.multi_reduction <maximumf>, %52, %cst_18 [1] : vector<8x8xf32> to vector<8xf32>
    %54 = vector.shape_cast %53 : vector<8xf32> to vector<8x1xf32>
    %55 = vector.broadcast %54 : vector<8x1xf32> to vector<8x8xf32>
    %56 = arith.subf %52, %55 : vector<8x8xf32>
    %57 = math.exp %56 : vector<8x8xf32>
    %cst_19 = arith.constant dense<0.000000e+00> : vector<8xf32>
    %58 = vector.multi_reduction <add>, %57, %cst_19 [1] : vector<8x8xf32> to vector<8xf32>
    %59 = vector.shape_cast %58 : vector<8xf32> to vector<8x1xf32>
    %60 = vector.broadcast %59 : vector<8x1xf32> to vector<8x8xf32>
    %61 = arith.divf %57, %60 : vector<8x8xf32>
    %62 = arith.truncf %61 : vector<8x8xf32> to vector<8x8xbf16>
    %cst_20 = arith.constant dense<0.000000e+00> : vector<8x8xf32>
    %63 = tpu.matmul %62, %51, %cst_20 {dimension_numbers = #tpu.dot_dimension_numbers<[1], [0], [0], [1], [0, 0, 1, 1], [], []>} : vector<8x8xbf16>, vector<8x8xbf16>, vector<8x8xf32> -> vector<8x8xf32>
    %c0_21 = arith.constant 0 : index
    %c0_22 = arith.constant 0 : index
    %c16 = arith.constant 16 : index
    %64 = vector.load %arg3[%c0_21, %c0_22, %c16] : memref<2x8x32xf32, #tpu.memory_space<vmem>>, vector<1x8x8xf32>
    %65 = vector.shape_cast %64 : vector<1x8x8xf32> to vector<8x8xf32>
    %66 = vector.shape_cast %63 : vector<8x8xf32> to vector<1x8x8xf32>
    tpu.vector_store %arg3[%c0_21, %c0_22, %c16], %66 {strides = array<i32>} : memref<2x8x32xf32, #tpu.memory_space<vmem>>, vector<1x8x8xf32>,
    %67 = vector.extract_strided_slice %3 {offsets = [0, 24], sizes = [8, 8], strides = [1, 1]} : vector<16x96xf32> to vector<8x8xf32>
    %68 = arith.truncf %67 : vector<8x8xf32> to vector<8x8xbf16>
    %69 = vector.extract_strided_slice %3 {offsets = [0, 56], sizes = [8, 8], strides = [1, 1]} : vector<16x96xf32> to vector<8x8xf32>
    %70 = arith.truncf %69 : vector<8x8xf32> to vector<8x8xbf16>
    %71 = vector.extract_strided_slice %3 {offsets = [0, 88], sizes = [8, 8], strides = [1, 1]} : vector<16x96xf32> to vector<8x8xf32>
    %72 = arith.truncf %71 : vector<8x8xf32> to vector<8x8xbf16>
    %cst_23 = arith.constant dense<0.000000e+00> : vector<8x8xf32>
    %73 = tpu.matmul %68, %70, %cst_23 {dimension_numbers = #tpu.dot_dimension_numbers<[1], [1], [0], [0], [0, 0, 1, 0], [], []>} : vector<8x8xbf16>, vector<8x8xbf16>, vector<8x8xf32> -> vector<8x8xf32>
    %cst_24 = arith.constant dense<0xFF800000> : vector<8xf32>
    %74 = vector.multi_reduction <maximumf>, %73, %cst_24 [1] : vector<8x8xf32> to vector<8xf32>
    %75 = vector.shape_cast %74 : vector<8xf32> to vector<8x1xf32>
    %76 = vector.broadcast %75 : vector<8x1xf32> to vector<8x8xf32>
    %77 = arith.subf %73, %76 : vector<8x8xf32>
    %78 = math.exp %77 : vector<8x8xf32>
    %cst_25 = arith.constant dense<0.000000e+00> : vector<8xf32>
    %79 = vector.multi_reduction <add>, %78, %cst_25 [1] : vector<8x8xf32> to vector<8xf32>
    %80 = vector.shape_cast %79 : vector<8xf32> to vector<8x1xf32>
    %81 = vector.broadcast %80 : vector<8x1xf32> to vector<8x8xf32>
    %82 = arith.divf %78, %81 : vector<8x8xf32>
    %83 = arith.truncf %82 : vector<8x8xf32> to vector<8x8xbf16>
    %cst_26 = arith.constant dense<0.000000e+00> : vector<8x8xf32>
    %84 = tpu.matmul %83, %72, %cst_26 {dimension_numbers = #tpu.dot_dimension_numbers<[1], [0], [0], [1], [0, 0, 1, 1], [], []>} : vector<8x8xbf16>, vector<8x8xbf16>, vector<8x8xf32> -> vector<8x8xf32>
    %c0_27 = arith.constant 0 : index
    %c0_28 = arith.constant 0 : index
    %c24 = arith.constant 24 : index
    %85 = vector.load %arg3[%c0_27, %c0_28, %c24] : memref<2x8x32xf32, #tpu.memory_space<vmem>>, vector<1x8x8xf32>
    %86 = vector.shape_cast %85 : vector<1x8x8xf32> to vector<8x8xf32>
    %87 = vector.shape_cast %84 : vector<8x8xf32> to vector<1x8x8xf32>
    tpu.vector_store %arg3[%c0_27, %c0_28, %c24], %87 {strides = array<i32>} : memref<2x8x32xf32, #tpu.memory_space<vmem>>, vector<1x8x8xf32>,
    %88 = vector.extract_strided_slice %3 {offsets = [8, 0], sizes = [8, 8], strides = [1, 1]} : vector<16x96xf32> to vector<8x8xf32>
    %89 = arith.truncf %88 : vector<8x8xf32> to vector<8x8xbf16>
    %90 = vector.extract_strided_slice %3 {offsets = [8, 32], sizes = [8, 8], strides = [1, 1]} : vector<16x96xf32> to vector<8x8xf32>
    %91 = arith.truncf %90 : vector<8x8xf32> to vector<8x8xbf16>
    %92 = vector.extract_strided_slice %3 {offsets = [8, 64], sizes = [8, 8], strides = [1, 1]} : vector<16x96xf32> to vector<8x8xf32>
    %93 = arith.truncf %92 : vector<8x8xf32> to vector<8x8xbf16>
    %cst_29 = arith.constant dense<0.000000e+00> : vector<8x8xf32>
    %94 = tpu.matmul %89, %91, %cst_29 {dimension_numbers = #tpu.dot_dimension_numbers<[1], [1], [0], [0], [0, 0, 1, 0], [], []>} : vector<8x8xbf16>, vector<8x8xbf16>, vector<8x8xf32> -> vector<8x8xf32>
    %cst_30 = arith.constant dense<0xFF800000> : vector<8xf32>
    %95 = vector.multi_reduction <maximumf>, %94, %cst_30 [1] : vector<8x8xf32> to vector<8xf32>
    %96 = vector.shape_cast %95 : vector<8xf32> to vector<8x1xf32>
    %97 = vector.broadcast %96 : vector<8x1xf32> to vector<8x8xf32>
    %98 = arith.subf %94, %97 : vector<8x8xf32>
    %99 = math.exp %98 : vector<8x8xf32>
    %cst_31 = arith.constant dense<0.000000e+00> : vector<8xf32>
    %100 = vector.multi_reduction <add>, %99, %cst_31 [1] : vector<8x8xf32> to vector<8xf32>
    %101 = vector.shape_cast %100 : vector<8xf32> to vector<8x1xf32>
    %102 = vector.broadcast %101 : vector<8x1xf32> to vector<8x8xf32>
    %103 = arith.divf %99, %102 : vector<8x8xf32>
    %104 = arith.truncf %103 : vector<8x8xf32> to vector<8x8xbf16>
    %cst_32 = arith.constant dense<0.000000e+00> : vector<8x8xf32>
    %105 = tpu.matmul %104, %93, %cst_32 {dimension_numbers = #tpu.dot_dimension_numbers<[1], [0], [0], [1], [0, 0, 1, 1], [], []>} : vector<8x8xbf16>, vector<8x8xbf16>, vector<8x8xf32> -> vector<8x8xf32>
    %c1 = arith.constant 1 : index
    %c0_33 = arith.constant 0 : index
    %c0_34 = arith.constant 0 : index
    %106 = vector.load %arg3[%c1, %c0_33, %c0_34] : memref<2x8x32xf32, #tpu.memory_space<vmem>>, vector<1x8x8xf32>
    %107 = vector.shape_cast %106 : vector<1x8x8xf32> to vector<8x8xf32>
    %108 = vector.shape_cast %105 : vector<8x8xf32> to vector<1x8x8xf32>
    tpu.vector_store %arg3[%c1, %c0_33, %c0_34], %108 {strides = array<i32>} : memref<2x8x32xf32, #tpu.memory_space<vmem>>, vector<1x8x8xf32>,
    %109 = vector.extract_strided_slice %3 {offsets = [8, 8], sizes = [8, 8], strides = [1, 1]} : vector<16x96xf32> to vector<8x8xf32>
    %110 = arith.truncf %109 : vector<8x8xf32> to vector<8x8xbf16>
    %111 = vector.extract_strided_slice %3 {offsets = [8, 40], sizes = [8, 8], strides = [1, 1]} : vector<16x96xf32> to vector<8x8xf32>
    %112 = arith.truncf %111 : vector<8x8xf32> to vector<8x8xbf16>
    %113 = vector.extract_strided_slice %3 {offsets = [8, 72], sizes = [8, 8], strides = [1, 1]} : vector<16x96xf32> to vector<8x8xf32>
    %114 = arith.truncf %113 : vector<8x8xf32> to vector<8x8xbf16>
    %cst_35 = arith.constant dense<0.000000e+00> : vector<8x8xf32>
    %115 = tpu.matmul %110, %112, %cst_35 {dimension_numbers = #tpu.dot_dimension_numbers<[1], [1], [0], [0], [0, 0, 1, 0], [], []>} : vector<8x8xbf16>, vector<8x8xbf16>, vector<8x8xf32> -> vector<8x8xf32>
    %cst_36 = arith.constant dense<0xFF800000> : vector<8xf32>
    %116 = vector.multi_reduction <maximumf>, %115, %cst_36 [1] : vector<8x8xf32> to vector<8xf32>
    %117 = vector.shape_cast %116 : vector<8xf32> to vector<8x1xf32>
    %118 = vector.broadcast %117 : vector<8x1xf32> to vector<8x8xf32>
    %119 = arith.subf %115, %118 : vector<8x8xf32>
    %120 = math.exp %119 : vector<8x8xf32>
    %cst_37 = arith.constant dense<0.000000e+00> : vector<8xf32>
    %121 = vector.multi_reduction <add>, %120, %cst_37 [1] : vector<8x8xf32> to vector<8xf32>
    %122 = vector.shape_cast %121 : vector<8xf32> to vector<8x1xf32>
    %123 = vector.broadcast %122 : vector<8x1xf32> to vector<8x8xf32>
    %124 = arith.divf %120, %123 : vector<8x8xf32>
    %125 = arith.truncf %124 : vector<8x8xf32> to vector<8x8xbf16>
    %cst_38 = arith.constant dense<0.000000e+00> : vector<8x8xf32>
    %126 = tpu.matmul %125, %114, %cst_38 {dimension_numbers = #tpu.dot_dimension_numbers<[1], [0], [0], [1], [0, 0, 1, 1], [], []>} : vector<8x8xbf16>, vector<8x8xbf16>, vector<8x8xf32> -> vector<8x8xf32>
    %c1_39 = arith.constant 1 : index
    %c0_40 = arith.constant 0 : index
    %c8_41 = arith.constant 8 : index
    %127 = vector.load %arg3[%c1_39, %c0_40, %c8_41] : memref<2x8x32xf32, #tpu.memory_space<vmem>>, vector<1x8x8xf32>
    %128 = vector.shape_cast %127 : vector<1x8x8xf32> to vector<8x8xf32>
    %129 = vector.shape_cast %126 : vector<8x8xf32> to vector<1x8x8xf32>
    tpu.vector_store %arg3[%c1_39, %c0_40, %c8_41], %129 {strides = array<i32>} : memref<2x8x32xf32, #tpu.memory_space<vmem>>, vector<1x8x8xf32>,
    %130 = vector.extract_strided_slice %3 {offsets = [8, 16], sizes = [8, 8], strides = [1, 1]} : vector<16x96xf32> to vector<8x8xf32>
    %131 = arith.truncf %130 : vector<8x8xf32> to vector<8x8xbf16>
    %132 = vector.extract_strided_slice %3 {offsets = [8, 48], sizes = [8, 8], strides = [1, 1]} : vector<16x96xf32> to vector<8x8xf32>
    %133 = arith.truncf %132 : vector<8x8xf32> to vector<8x8xbf16>
    %134 = vector.extract_strided_slice %3 {offsets = [8, 80], sizes = [8, 8], strides = [1, 1]} : vector<16x96xf32> to vector<8x8xf32>
    %135 = arith.truncf %134 : vector<8x8xf32> to vector<8x8xbf16>
    %cst_42 = arith.constant dense<0.000000e+00> : vector<8x8xf32>
    %136 = tpu.matmul %131, %133, %cst_42 {dimension_numbers = #tpu.dot_dimension_numbers<[1], [1], [0], [0], [0, 0, 1, 0], [], []>} : vector<8x8xbf16>, vector<8x8xbf16>, vector<8x8xf32> -> vector<8x8xf32>
    %cst_43 = arith.constant dense<0xFF800000> : vector<8xf32>
    %137 = vector.multi_reduction <maximumf>, %136, %cst_43 [1] : vector<8x8xf32> to vector<8xf32>
    %138 = vector.shape_cast %137 : vector<8xf32> to vector<8x1xf32>
    %139 = vector.broadcast %138 : vector<8x1xf32> to vector<8x8xf32>
    %140 = arith.subf %136, %139 : vector<8x8xf32>
    %141 = math.exp %140 : vector<8x8xf32>
    %cst_44 = arith.constant dense<0.000000e+00> : vector<8xf32>
    %142 = vector.multi_reduction <add>, %141, %cst_44 [1] : vector<8x8xf32> to vector<8xf32>
    %143 = vector.shape_cast %142 : vector<8xf32> to vector<8x1xf32>
    %144 = vector.broadcast %143 : vector<8x1xf32> to vector<8x8xf32>
    %145 = arith.divf %141, %144 : vector<8x8xf32>
    %146 = arith.truncf %145 : vector<8x8xf32> to vector<8x8xbf16>
    %cst_45 = arith.constant dense<0.000000e+00> : vector<8x8xf32>
    %147 = tpu.matmul %146, %135, %cst_45 {dimension_numbers = #tpu.dot_dimension_numbers<[1], [0], [0], [1], [0, 0, 1, 1], [], []>} : vector<8x8xbf16>, vector<8x8xbf16>, vector<8x8xf32> -> vector<8x8xf32>
    %c1_46 = arith.constant 1 : index
    %c0_47 = arith.constant 0 : index
    %c16_48 = arith.constant 16 : index
    %148 = vector.load %arg3[%c1_46, %c0_47, %c16_48] : memref<2x8x32xf32, #tpu.memory_space<vmem>>, vector<1x8x8xf32>
    %149 = vector.shape_cast %148 : vector<1x8x8xf32> to vector<8x8xf32>
    %150 = vector.shape_cast %147 : vector<8x8xf32> to vector<1x8x8xf32>
    tpu.vector_store %arg3[%c1_46, %c0_47, %c16_48], %150 {strides = array<i32>} : memref<2x8x32xf32, #tpu.memory_space<vmem>>, vector<1x8x8xf32>,
    %151 = vector.extract_strided_slice %3 {offsets = [8, 24], sizes = [8, 8], strides = [1, 1]} : vector<16x96xf32> to vector<8x8xf32>
    %152 = arith.truncf %151 : vector<8x8xf32> to vector<8x8xbf16>
    %153 = vector.extract_strided_slice %3 {offsets = [8, 56], sizes = [8, 8], strides = [1, 1]} : vector<16x96xf32> to vector<8x8xf32>
    %154 = arith.truncf %153 : vector<8x8xf32> to vector<8x8xbf16>
    %155 = vector.extract_strided_slice %3 {offsets = [8, 88], sizes = [8, 8], strides = [1, 1]} : vector<16x96xf32> to vector<8x8xf32>
    %156 = arith.truncf %155 : vector<8x8xf32> to vector<8x8xbf16>
    %cst_49 = arith.constant dense<0.000000e+00> : vector<8x8xf32>
    %157 = tpu.matmul %152, %154, %cst_49 {dimension_numbers = #tpu.dot_dimension_numbers<[1], [1], [0], [0], [0, 0, 1, 0], [], []>} : vector<8x8xbf16>, vector<8x8xbf16>, vector<8x8xf32> -> vector<8x8xf32>
    %cst_50 = arith.constant dense<0xFF800000> : vector<8xf32>
    %158 = vector.multi_reduction <maximumf>, %157, %cst_50 [1] : vector<8x8xf32> to vector<8xf32>
    %159 = vector.shape_cast %158 : vector<8xf32> to vector<8x1xf32>
    %160 = vector.broadcast %159 : vector<8x1xf32> to vector<8x8xf32>
    %161 = arith.subf %157, %160 : vector<8x8xf32>
    %162 = math.exp %161 : vector<8x8xf32>
    %cst_51 = arith.constant dense<0.000000e+00> : vector<8xf32>
    %163 = vector.multi_reduction <add>, %162, %cst_51 [1] : vector<8x8xf32> to vector<8xf32>
    %164 = vector.shape_cast %163 : vector<8xf32> to vector<8x1xf32>
    %165 = vector.broadcast %164 : vector<8x1xf32> to vector<8x8xf32>
    %166 = arith.divf %162, %165 : vector<8x8xf32>
    %167 = arith.truncf %166 : vector<8x8xf32> to vector<8x8xbf16>
    %cst_52 = arith.constant dense<0.000000e+00> : vector<8x8xf32>
    %168 = tpu.matmul %167, %156, %cst_52 {dimension_numbers = #tpu.dot_dimension_numbers<[1], [0], [0], [1], [0, 0, 1, 1], [], []>} : vector<8x8xbf16>, vector<8x8xbf16>, vector<8x8xf32> -> vector<8x8xf32>
    %c1_53 = arith.constant 1 : index
    %c0_54 = arith.constant 0 : index
    %c24_55 = arith.constant 24 : index
    %169 = vector.load %arg3[%c1_53, %c0_54, %c24_55] : memref<2x8x32xf32, #tpu.memory_space<vmem>>, vector<1x8x8xf32>
    %170 = vector.shape_cast %169 : vector<1x8x8xf32> to vector<8x8xf32>
    %171 = vector.shape_cast %168 : vector<8x8xf32> to vector<1x8x8xf32>
    tpu.vector_store %arg3[%c1_53, %c0_54, %c24_55], %171 {strides = array<i32>} : memref<2x8x32xf32, #tpu.memory_space<vmem>>, vector<1x8x8xf32>,
    return
  }
  func.func @transform_0(%arg0: i32) -> (i32, i32, i32) {
    %c0_i32 = arith.constant 0 : i32
    %c0_i32_0 = arith.constant 0 : i32
    %c0_i32_1 = arith.constant 0 : i32
    return %arg0, %c0_i32, %c0_i32_0 : i32, i32, i32
  }
  func.func @transform_1(%arg0: i32) -> (i32, i32) {
    %c0_i32 = arith.constant 0 : i32
    %c0_i32_0 = arith.constant 0 : i32
    %c0_i32_1 = arith.constant 0 : i32
    return %c0_i32, %c0_i32_0 : i32, i32
  }
  func.func @transform_2(%arg0: i32) -> (i32, i32, i32) {
    %c0_i32 = arith.constant 0 : i32
    %c0_i32_0 = arith.constant 0 : i32
    %c0_i32_1 = arith.constant 0 : i32
    return %arg0, %c0_i32, %c0_i32_0 : i32, i32, i32
  }
}

</mosaic_0001>

<bundles_post_ra>
// kernel: tpu_custom_call.1
= control target key start
LH: loop header
LB: loop body
LE: loop exit
PB: predicated region body
PF: predicated region fallthrough
CT: control target
= control target key end

     0   :  { %7 = vsyncpa [#allocation3], 0  ;;  %s1036_s0 = inlined_call_operand.hbm [shape: bf16[2,8,32], index: 0, kind: input, shape index: {}]   ;;  %s1037_s1 = inlined_call_operand.hbm [shape: bf16[32,96], index: 1, kind: input, shape index: {}]   ;;  %s1038_s2 = inlined_call_operand.hbm [shape: f32[2,8,32], index: 2, kind: output, shape index: {}]  }
   0x1   :  { %8 = vsyncpa [#allocation6], 0 }
   0x2   :  { %9 = vsyncpa [#allocation4], 0  ;;  %s14_s11 = sshll.u32 %s1036_s0, 4  ;;  %s857_s12 = smov [#allocation2]   ;;  %s15_s11 = int_to_ptr.hbm [resolvable:$true] %s14_s11 }
   0x3   :  { %s16_s13 = sshll.u32 %s857_s12, 4  ;;  %s27_s16 = sshll.u32 %s1037_s1, 4  ;;  %s17_s13 = int_to_ptr.vmem [resolvable:$true] %s16_s13  ;;  %s28_s16 = int_to_ptr.hbm [resolvable:$true] %s27_s16 }
   0x4   :  { %s858_s17 = smov 64   ;;  %s859_s18 = smov 4  }
   0x5   :  { %22 = dma.hbm_to_vmem [thread:$0]  %s15_s11, 128, %s17_s13, [#allocation3], %s858_s17, %s858_s17, %s859_s18  }
   0x6   :  { %s860_s19 = smov [#allocation5]  }
   0x7   :  { %s29_s20 = sshll.u32 %s860_s19, 4  ;;  %s30_s20 = int_to_ptr.vmem [resolvable:$true] %s29_s20 }
   0x8   :  { %35 = dma.hbm_to_vmem [thread:$0]  %s28_s16, 256, %s30_s20, [#allocation6], %s858_s17, %s858_s17, %s859_s18  }
   0x9   :  { %851 = dma.done.wait [#allocation3], 128  }
   0xa   :  { %852 = vsyncadd [#allocation3], 4294967168 }
   0xb   :  { %853 = dma.done.wait [#allocation6], 256  }
   0xc   :  { %854 = vsyncadd [#allocation6], 4294967040  ;;  %v727_v0 = vld [vmem:[#allocation5 + $0x8] sm:$0xff]  ;;  %v726_v1 = vld [vmem:[#allocation5] sm:$0xff]  ;;  %vm68_vm0 = vcmask 261120   ;;  %s861_s0 = smov 104  }
   0xd   :  { %78 = vmatpush.bf16.msra.mxu0 %v727_v0  ;;  %v725_v2 = vld [vmem:[#allocation2] sm:$0xff]  ;;  %s862_s1 = smov 120   ;;  %s863_s21 = smov 96   ;;  %vm90_vm1 = vcmask 64512   ;;  %vm140_vm2 = vcmask 1043456  }
   0xe   :  { %s864_s22 = smov 80   ;;  %s865_s23 = smov 72  }
   0xf   :  { %s866_s24 = smov 88   ;;  %s867_s25 = smov 112  }
  0x10   :  { %s868_s26 = smov 56   ;;  %s869_s27 = smov 40  }
  0x11   :  { %79 = vmatpush.bf16.msra.mxu0 %v726_v1  ;;  %s870_s28 = smov 48   ;;  %s871_s29 = smov 16  }
  0x12   :  { %s872_s30 = smov 8   ;;  %s873_s3 = smov 24  }
  0x13   :  { %s682_s6 = sshll.u32 %s1038_s2, 4  ;;  %s874_s7 = smov [#allocation7]   ;;  %s683_s6 = int_to_ptr.hbm [resolvable:$true] %s682_s6 }
  0x14   :  { %708 = vmatmul.msk.bf16.vlgmr.msra.gmra.mxu0 %vm68_vm0, %v725_v2  ;;  %s680_s8 = sshll.u32 %s874_s7, 4  ;;  %s875_s9 = smov 128   ;;  %s681_s8 = int_to_ptr.vmem [resolvable:$true] %s680_s8 }
  0x91   :  { %v81_v3 = vpop.f32.mrf.mxu0 }
  0x92   :  { %v901_v4 = vpack.c.bf16 %v81_v3, %v81_v3 }
  0x94   :  { %308 = vrot.lane.b32.xlu2 %v901_v4, %s861_s0  ;;  %158 = vrot.lane.b32.xlu1 %v901_v4, %s862_s1 }
  0x95   :  { %88 = vrot.lane.b32.xlu0 %v901_v4, %s863_s21 }
  0x99   :  { %v83_v5 = vpop.f32.mrf.mxu0 }
  0x9a   :  { %v909_v6 = vpack.c.bf16 %v83_v5, %v83_v5 }
  0x9c   :  { %235 = vrot.lane.b32.xlu2 %v901_v4, %s864_s22  ;;  %310 = vrot.lane.b32.xlu1 %v901_v4, %s865_s23 }
  0x9d   :  { %160 = vrot.lane.b32.xlu0 %v901_v4, %s866_s24 }
  0xa4   :  { %233 = vrot.lane.b32.xlu1 %v901_v4, %s867_s25  ;;  %454 = vrot.lane.b32.xlu2 %v909_v6, %s862_s1 }
  0xa5   :  { %456 = vrot.lane.b32.xlu0 %v909_v6, %s866_s24 }
  0xac   :  { %604 = vrot.lane.b32.xlu1 %v909_v6, %s865_s23  ;;  %602 = vrot.lane.b32.xlu2 %v909_v6, %s861_s0 }
  0xad   :  { %385 = vrot.lane.b32.xlu0 %v909_v6, %s863_s21 }
  0xb4   :  { %528 = vrot.lane.b32.xlu1 %v909_v6, %s867_s25 }
  0xb5   :  { %530 = vrot.lane.b32.xlu0 %v909_v6, %s864_s22 }
  0xee   :  { %v309_v7 = vpop.permute.xlu2 %308 }
  0xf6   :  { %v236_v8 = vpop.permute.xlu2 %235 }
  0xf7   :  { %v241_v9 = vsel %vm90_vm1, %v236_v8, 0 }
  0xf8   :  { %250 = vmatpush.bf16.xpose.msrb.mxu0 %v241_v9 }
  0xfe   :  { %v455_v26 = vpop.permute.xlu2 %454 }
 0x106   :  { %v159_v10 = vpop.permute.xlu1 %158  ;;  %v603_v28 = vpop.permute.xlu2 %602 }
 0x107   :  { %v89_v11 = vpop.permute.xlu0 %88 }
 0x108   :  { %v95_v12 = vsel %vm90_vm1, %v89_v11, 0 }
 0x109   :  { %104 = vmatpush.bf16.xpose.msra.mxu1 %v95_v12 }
 0x10e   :  { %v311_v13 = vpop.permute.xlu1 %310 }
 0x10f   :  { %v161_v14 = vpop.permute.xlu0 %160  ;;  %v316_v15 = vsel %vm90_vm1, %v311_v13, 0 }
 0x110   :  { %709 = vmatmul.msk.bf16.vlgmr.msra.gmra.mxu1 %vm90_vm1, %v901_v4  ;;  %v166_v16 = vsel %vm90_vm1, %v161_v14, 0 }
 0x111   :  { %175 = vmatpush.bf16.xpose.msra.mxu3 %v166_v16 }
 0x116   :  { %v234_v17 = vpop.permute.xlu1 %233 }
 0x117   :  { %v457_v18 = vpop.permute.xlu0 %456  ;;  %713 = vmatmul.msk.bf16.vlgmr.msrb.gmra.mxu0 %vm90_vm1, %v234_v17 }
 0x118   :  { %v462_v19 = vsel %vm90_vm1, %v457_v18, 0  ;;  %711 = vmatmul.msk.bf16.vlgmr.msra.gmra.mxu3 %vm90_vm1, %v159_v10 }
 0x119   :  { %325 = vmatpush.bf16.xpose.msrb.mxu3 %v316_v15 }
 0x11e   :  { %v605_v22 = vpop.permute.xlu1 %604 }
 0x11f   :  { %v386_v20 = vpop.permute.xlu0 %385  ;;  %v610_v24 = vsel %vm90_vm1, %v605_v22, 0 }
 0x120   :  { %v391_v21 = vsel %vm90_vm1, %v386_v20, 0 }
 0x121   :  { %471 = vmatpush.bf16.xpose.msra.mxu3 %v462_v19  ;;  %400 = vmatpush.bf16.xpose.msra.mxu0 %v391_v21 }
 0x126   :  { %v529_v27 = vpop.permute.xlu1 %528 }
 0x127   :  { %v531_v23 = vpop.permute.xlu0 %530 }
 0x128   :  { %v536_v25 = vsel %vm90_vm1, %v531_v23, 0  ;;  %715 = vmatmul.msk.bf16.vlgmr.msrb.gmra.mxu3 %vm90_vm1, %v309_v7  ;;  %717 = vmatmul.msk.bf16.vlgmr.msra.gmra.mxu0 %vm90_vm1, %v909_v6 }
 0x129   :  { %619 = vmatpush.bf16.xpose.msrb.mxu3 %v610_v24  ;;  %545 = vmatpush.bf16.xpose.msrb.mxu0 %v536_v25 }
 0x138   :  { %719 = vmatmul.msk.bf16.vlgmr.msra.gmra.mxu3 %vm90_vm1, %v455_v26  ;;  %721 = vmatmul.msk.bf16.vlgmr.msrb.gmra.mxu0 %vm90_vm1, %v529_v27 }
 0x148   :  { %723 = vmatmul.msk.bf16.vlgmr.msrb.gmra.mxu3 %vm90_vm1, %v603_v28 }
 0x18d   :  { %v106_v29 = vpop.f32.mrf.mxu1 }
 0x18e   :  { %v110_v30 = vsel %vm90_vm1, %v106_v29, -inf }
 0x18f   :  { %111 = vmax.xlane.f32.xlu2 %v110_v30 }
 0x194   :  { %v252_v31 = vpop.f32.mrf.mxu0 }
 0x195   :  { %v108_v32 = vpop.f32.mrf.mxu1  ;;  %v256_v33 = vsel %vm90_vm1, %v252_v31, -inf }
 0x197   :  { %257 = vmax.xlane.f32.xlu2 %v256_v33 }
 0x19b   :  { %v177_v34 = vpop.f32.mrf.mxu3 }
 0x19c   :  { %v181_v35 = vsel %vm90_vm1, %v177_v34, -inf  ;;  %v254_v36 = vpop.f32.mrf.mxu0 }
 0x19d   :  { %182 = vmax.xlane.f32.xlu0 %v181_v35 }
 0x1a3   :  { %v179_v37 = vpop.f32.mrf.mxu3 }
 0x1a5   :  { %v402_v38 = vpop.f32.mrf.mxu0 }
 0x1a6   :  { %v406_v39 = vsel %vm90_vm1, %v402_v38, -inf }
 0x1a7   :  { %407 = vmax.xlane.f32.xlu1 %v406_v39 }
 0x1ab   :  { %v327_v40 = vpop.f32.mrf.mxu3 }
 0x1ac   :  { %v331_v42 = vsel %vm90_vm1, %v327_v40, -inf }
 0x1ad   :  { %v404_v41 = vpop.f32.mrf.mxu0 }
 0x1af   :  { %135 = vrot.lane.b32.xlu2 %v901_v4, %s858_s17  ;;  %332 = vmax.xlane.f32.xlu1 %v331_v42 }
 0x1b3   :  { %v329_v43 = vpop.f32.mrf.mxu3 }
 0x1b5   :  { %v944_v44 = vpop.f32.mrf.mxu0 }
 0x1b6   :  { %v551_v52 = vsel %vm90_vm1, %v944_v44, -inf }
 0x1bb   :  { %v473_v45 = vpop.f32.mrf.mxu3 }
 0x1bc   :  { %v477_v50 = vsel %vm90_vm1, %v473_v45, -inf }
 0x1bd   :  { %v549_v46 = vpop.f32.mrf.mxu0 }
 0x1c3   :  { %v475_v47 = vpop.f32.mrf.mxu3 }
 0x1c8   :  { %206 = vrot.lane.b32.xlu1 %v901_v4, %s868_s26 }
 0x1cb   :  { %v621_v48 = vpop.f32.mrf.mxu3 }
 0x1cc   :  { %v625_v51 = vsel %vm90_vm1, %v621_v48, -inf }
 0x1d3   :  { %v623_v49 = vpop.f32.mrf.mxu3 }
 0x1d8   :  { %478 = vmax.xlane.f32.xlu2 %v477_v50 }
 0x1e0   :  { %626 = vmax.xlane.f32.xlu2 %v625_v51 }
 0x1f2   :  { %552 = vmax.xlane.f32.xlu1 %v551_v52 }
 0x1f8   :  { %356 = vrot.lane.b32.xlu2 %v901_v4, %s869_s27 }
 0x202   :  { %v112_v53 = vpop.xlane.xlu2 %111 }
 0x203   :  { %v113_v54 = vsub.f32 %v106_v29, %v112_v53 }
 0x205   :  { %v114_v55 = vmul.f32 1.442695, %v113_v54 }
 0x207   :  { %747 = vpow2.f32 %v114_v55 }
 0x20a   :  { %v258_v56 = vpop.xlane.xlu2 %257 }
 0x20b   :  { %v259_v57 = vsub.f32 %v252_v31, %v258_v56  ;;  %281 = vrot.lane.b32.xlu1 %v901_v4, %s870_s28 }
 0x20d   :  { %v956_v58 = vpop.eup %747  ;;  %v260_v59 = vmul.f32 1.442695, %v259_v57 }
 0x20e   :  { %v116_v60 = vsel %vm90_vm1, %v956_v58, 0.0 }
 0x20f   :  { %749 = vpow2.f32 %v260_v59  ;;  %117 = vadd.xlane.f32.xlu0 %v116_v60 }
 0x210   :  { %v183_v61 = vpop.xlane.xlu0 %182 }
 0x211   :  { %v184_v62 = vsub.f32 %v177_v34, %v183_v61 }
 0x212   :  { %v136_v63 = vpop.permute.xlu2 %135 }
 0x213   :  { %v185_v0 = vmul.f32 1.442695, %v184_v62  ;;  %v142_v1 = vsel %vm140_vm2, %v136_v63, 0 }
 0x214   :  { %151 = vmatpush.bf16.msra.mxu2 %v142_v1 }
 0x215   :  { %v961_v2 = vpop.eup %749  ;;  %751 = vpow2.f32 %v185_v0 }
 0x216   :  { %v262_v3 = vsel %vm90_vm1, %v961_v2, 0.0 }
 0x217   :  { %263 = vadd.xlane.f32.xlu0 %v262_v3 }
 0x21a   :  { %v408_v4 = vpop.xlane.xlu1 %407 }
 0x21b   :  { %v965_v5 = vpop.eup %751  ;;  %v409_v7 = vsub.f32 %v402_v38, %v408_v4 }
 0x21c   :  { %v187_v9 = vsel %vm90_vm1, %v965_v5, 0.0 }
 0x21d   :  { %v410_v8 = vmul.f32 1.442695, %v409_v7 }
 0x21f   :  { %753 = vpow2.f32 %v410_v8  ;;  %188 = vadd.xlane.f32.xlu0 %v187_v9 }
 0x222   :  { %v333_v10 = vpop.xlane.xlu1 %332 }
 0x223   :  { %v334_v11 = vsub.f32 %v327_v40, %v333_v10 }
 0x225   :  { %v969_v12 = vpop.eup %753  ;;  %v335_v13 = vmul.f32 1.442695, %v334_v11 }
 0x226   :  { %v412_v14 = vsel %vm90_vm1, %v969_v12, 0.0 }
 0x227   :  { %755 = vpow2.f32 %v335_v13  ;;  %413 = vadd.xlane.f32.xlu0 %v412_v14 }
 0x22d   :  { %v973_v15 = vpop.eup %755 }
 0x22e   :  { %v337_v16 = vsel %vm90_vm1, %v973_v15, 0.0 }
 0x22f   :  { %338 = vadd.xlane.f32.xlu0 %v337_v16 }
 0x23a   :  { %v207_v17 = vpop.permute.xlu1 %206 }
 0x23b   :  { %v212_v18 = vsel %vm140_vm2, %v207_v17, 0 }
 0x23c   :  { %221 = vmatpush.bf16.msrb.mxu2 %v212_v18 }
 0x24b   :  { %v479_v19 = vpop.xlane.xlu2 %478 }
 0x24c   :  { %v480_v20 = vsub.f32 %v473_v45, %v479_v19 }
 0x24e   :  { %v481_v21 = vmul.f32 1.442695, %v480_v20 }
 0x250   :  { %757 = vpow2.f32 %v481_v21 }
 0x253   :  { %v627_v22 = vpop.xlane.xlu2 %626 }
 0x254   :  { %v628_v23 = vsub.f32 %v621_v48, %v627_v22 }
 0x256   :  { %v978_v24 = vpop.eup %757  ;;  %v629_v25 = vmul.f32 1.442695, %v628_v23 }
 0x257   :  { %v483_v26 = vsel %vm90_vm1, %v978_v24, 0.0 }
 0x258   :  { %759 = vpow2.f32 %v629_v25  ;;  %484 = vadd.xlane.f32.xlu0 %v483_v26 }
 0x25b   :  { %v357_v52 = vpop.permute.xlu2 %356 }
 0x25c   :  { %v362_v60 = vsel %vm140_vm2, %v357_v52, 0 }
 0x25e   :  { %v982_v27 = vpop.eup %759 }
 0x25f   :  { %v631_v28 = vsel %vm90_vm1, %v982_v27, 0.0 }
 0x260   :  { %632 = vadd.xlane.f32.xlu2 %v631_v28 }
 0x265   :  { %v553_v29 = vpop.xlane.xlu1 %552 }
 0x266   :  { %v554_v30 = vsub.f32 %v944_v44, %v553_v29 }
 0x268   :  { %v555_v31 = vmul.f32 1.442695, %v554_v30 }
 0x26a   :  { %761 = vpow2.f32 %v555_v31 }
 0x26c   :  { %502 = vrot.lane.b32.xlu0 %v909_v6, %s868_s26 }
 0x270   :  { %v989_v32 = vpop.eup %761 }
 0x271   :  { %v557_v33 = vsel %vm90_vm1, %v989_v32, 0.0 }
 0x272   :  { %558 = vadd.xlane.f32.xlu1 %v557_v33 }
 0x274   :  { %431 = vrot.lane.b32.xlu0 %v909_v6, %s858_s17 }
 0x27c   :  { %650 = vrot.lane.b32.xlu0 %v909_v6, %s869_s27 }
 0x27d   :  { %v282_v34 = vpop.permute.xlu1 %281 }
 0x27e   :  { %v287_v35 = vsel %vm140_vm2, %v282_v34, 0 }
 0x27f   :  { %296 = vmatpush.bf16.msrb.mxu1 %v287_v35 }
 0x282   :  { %v118_v36 = vpop.xlane.xlu0 %117 }
 0x283   :  { %763 = vrcp.f32 %v118_v36  ;;  %v130_v42 = vand.u32 2147483648, %v118_v36  ;;  %v128_v43 = vand.u32 2147483647, %v118_v36  ;;  %vm124_vm4 = vweird.f32 %v118_v36 }
 0x284   :  { %576 = vrot.lane.b32.xlu0 %v909_v6, %s870_s28 }
 0x285   :  { %v131_v46 = vor.u32 1.1754944e-38, %v130_v42  ;;  %vm129_vm6 = vcmp.eq.f32.partialorder %v128_v43, 8.507059e+37 }
 0x289   :  { %v764_v37 = vpop.eup %763 }
 0x28a   :  { %v120_v38 = vmul.f32 %v764_v37, %v118_v36  ;;  %v264_v39 = vpop.xlane.xlu0 %263  ;;  %vm125_vm3 = vweird.f32 %v764_v37 }
 0x28b   :  { %765 = vrcp.f32 %v264_v39  ;;  %vm126_vm5 = vmor %vm124_vm4, %vm125_vm3  ;;  %v276_v54 = vand.u32 2147483648, %v264_v39  ;;  %v274_v55 = vand.u32 2147483647, %v264_v39  ;;  %vm270_vm8 = vweird.f32 %v264_v39 }
 0x28c   :  { %v121_v40 = vsub.f32 1.0, %v120_v38 }
 0x28d   :  { %v277_v61 = vor.u32 1.1754944e-38, %v276_v54  ;;  %vm275_vm10 = vcmp.eq.f32.partialorder %v274_v55, 8.507059e+37 }
 0x28e   :  { %v122_v41 = vmul.f32 %v764_v37, %v121_v40 }
 0x290   :  { %v123_v44 = vadd.f32 %v764_v37, %v122_v41 }
 0x291   :  { %v766_v45 = vpop.eup %765 }
 0x292   :  { %v266_v47 = vmul.f32 %v766_v45, %v264_v39  ;;  %v189_v48 = vpop.xlane.xlu0 %188  ;;  %v127_v49 = vsel %vm126_vm5, %v764_v37, %v123_v44  ;;  %vm271_vm7 = vweird.f32 %v766_v45 }
 0x293   :  { %767 = vrcp.f32 %v189_v48  ;;  %v132_v50 = vsel %vm129_vm6, %v131_v46, %v127_v49  ;;  %vm272_vm9 = vmor %vm270_vm8, %vm271_vm7  ;;  %v201_v7 = vand.u32 2147483648, %v189_v48  ;;  %v199_v8 = vand.u32 2147483647, %v189_v48 }
 0x294   :  { %v267_v6 = vsub.f32 1.0, %v266_v47  ;;  %v133_v51 = vmul.f32 %v956_v58, %v132_v50  ;;  %vm195_vm12 = vweird.f32 %v189_v48 }
 0x295   :  { %v202_v11 = vor.u32 1.1754944e-38, %v201_v7  ;;  %vm200_vm14 = vcmp.eq.f32.partialorder %v199_v8, 8.507059e+37 }
 0x296   :  { %v268_v53 = vmul.f32 %v766_v45, %v267_v6  ;;  %v134_v56 = vpack.c.bf16 %v133_v51, %v133_v51 }
 0x298   :  { %v269_v57 = vadd.f32 %v766_v45, %v268_v53  ;;  %710 = vmatmul.msk.bf16.vlgmr.msra.gmra.mxu2 %vm90_vm1, %v134_v56 }
 0x299   :  { %v768_v59 = vpop.eup %767  ;;  %371 = vmatpush.bf16.msra.mxu2 %v362_v60 }
 0x29a   :  { %v191_v62 = vmul.f32 %v768_v59, %v189_v48  ;;  %v1003_v63 = vpop.xlane.xlu0 %413  ;;  %v273_v58 = vsel %vm272_vm9, %v766_v45, %v269_v57  ;;  %vm196_vm11 = vweird.f32 %v768_v59 }
 0x29b   :  { %v278_v1 = vsel %vm275_vm10, %v277_v61, %v273_v58  ;;  %vm197_vm13 = vmor %vm195_vm12, %vm196_vm11  ;;  %v426_v49 = vand.u32 2147483648, %v1003_v63  ;;  %vm420_vm10 = vweird.f32 %v1003_v63  ;;  %v424_v50 = vand.u32 2147483647, %v1003_v63 }
 0x29c   :  { %v192_v0 = vsub.f32 1.0, %v191_v62  ;;  %v279_v3 = vmul.f32 %v961_v2, %v278_v1 }
 0x29d   :  { %v427_v57 = vor.u32 1.1754944e-38, %v426_v49  ;;  %vm425_vm12 = vcmp.eq.f32.partialorder %v424_v50, 8.507059e+37 }
 0x29e   :  { %v193_v4 = vmul.f32 %v768_v59, %v192_v0  ;;  %v280_v9 = vpack.c.bf16 %v279_v3, %v279_v3 }
 0x2a0   :  { %v194_v10 = vadd.f32 %v768_v59, %v193_v4  ;;  %714 = vmatmul.msk.bf16.vlgmr.msrb.gmra.mxu1 %vm90_vm1, %v280_v9 }
 0x2a2   :  { %v339_v13 = vpop.xlane.xlu0 %338  ;;  %v198_v14 = vsel %vm197_vm13, %v768_v59, %v194_v10 }
 0x2a3   :  { %769 = vrcp.f32 %v339_v13  ;;  %v203_v16 = vsel %vm200_vm14, %v202_v11, %v198_v14  ;;  %v351_v21 = vand.u32 2147483648, %v339_v13  ;;  %v349_v23 = vand.u32 2147483647, %v339_v13 }
 0x2a4   :  { %v204_v17 = vmul.f32 %v965_v5, %v203_v16  ;;  %vm345_vm0 = vweird.f32 %v339_v13  ;;  %771 = vrcp.f32 %v1003_v63 }
 0x2a5   :  { %v352_v26 = vor.u32 1.1754944e-38, %v351_v21  ;;  %vm350_vm4 = vcmp.eq.f32.partialorder %v349_v23, 8.507059e+37 }
 0x2a6   :  { %v205_v18 = vpack.c.bf16 %v204_v17, %v204_v17 }
 0x2a8   :  { %712 = vmatmul.msk.bf16.vlgmr.msrb.gmra.mxu2 %vm90_vm1, %v205_v18 }
 0x2a9   :  { %v770_v2 = vpop.eup %769 }
 0x2aa   :  { %v341_v19 = vmul.f32 %v770_v2, %v339_v13  ;;  %vm346_vm15 = vweird.f32 %v770_v2  ;;  %v772_v33 = vpop.eup %771 }
 0x2ab   :  { %vm347_vm3 = vmor %vm345_vm0, %vm346_vm15  ;;  %v416_v34 = vmul.f32 %v772_v33, %v1003_v63  ;;  %vm421_vm7 = vweird.f32 %v772_v33 }
 0x2ac   :  { %v342_v20 = vsub.f32 1.0, %v341_v19  ;;  %vm422_vm11 = vmor %vm420_vm10, %vm421_vm7  ;;  %vm306_vm7 = vcmask 195712  }
 0x2ad   :  { %v417_v36 = vsub.f32 1.0, %v416_v34 }
 0x2ae   :  { %v343_v22 = vmul.f32 %v770_v2, %v342_v20 }
 0x2af   :  { %v418_v41 = vmul.f32 %v772_v33, %v417_v36 }
 0x2b0   :  { %v344_v25 = vadd.f32 %v770_v2, %v343_v22 }
 0x2b1   :  { %v419_v46 = vadd.f32 %v772_v33, %v418_v41 }
 0x2b2   :  { %v348_v28 = vsel %vm347_vm3, %v770_v2, %v344_v25 }
 0x2b3   :  { %v353_v29 = vsel %vm350_vm4, %v352_v26, %v348_v28  ;;  %v423_v54 = vsel %vm422_vm11, %v772_v33, %v419_v46 }
 0x2b4   :  { %v354_v30 = vmul.f32 %v973_v15, %v353_v29  ;;  %v428_v60 = vsel %vm425_vm12, %v427_v57, %v423_v54 }
 0x2b5   :  { %v429_v63 = vmul.f32 %v969_v12, %v428_v60 }
 0x2b6   :  { %v355_v5 = vpack.c.bf16 %v354_v30, %v354_v30 }
 0x2b7   :  { %v430_v7 = vpack.c.bf16 %v429_v63, %v429_v63 }
 0x2b8   :  { %716 = vmatmul.msk.bf16.vlgmr.msra.gmra.mxu2 %vm90_vm1, %v355_v5 }
 0x2cb   :  { %v485_v31 = vpop.xlane.xlu0 %484 }
 0x2cc   :  { %773 = vrcp.f32 %v485_v31  ;;  %v497_v40 = vand.u32 2147483648, %v485_v31  ;;  %v495_v15 = vand.u32 2147483647, %v485_v31  ;;  %vm491_vm6 = vweird.f32 %v485_v31 }
 0x2ce   :  { %v498_v45 = vor.u32 1.1754944e-38, %v497_v40  ;;  %vm496_vm9 = vcmp.eq.f32.partialorder %v495_v15, 8.507059e+37 }
 0x2d2   :  { %v774_v35 = vpop.eup %773 }
 0x2d3   :  { %v487_v37 = vmul.f32 %v774_v35, %v485_v31  ;;  %v633_v38 = vpop.xlane.xlu2 %632  ;;  %vm492_vm5 = vweird.f32 %v774_v35 }
 0x2d4   :  { %775 = vrcp.f32 %v633_v38  ;;  %vm493_vm8 = vmor %vm491_vm6, %vm492_vm5  ;;  %v645_v62 = vand.u32 2147483648, %v633_v38  ;;  %vm639_vm14 = vweird.f32 %v633_v38 }
 0x2d5   :  { %v488_v39 = vsub.f32 1.0, %v487_v37 }
 0x2d6   :  { %v646_v4 = vor.u32 1.1754944e-38, %v645_v62 }
 0x2d7   :  { %v489_v42 = vmul.f32 %v774_v35, %v488_v39 }
 0x2d9   :  { %v490_v43 = vadd.f32 %v774_v35, %v489_v42 }
 0x2da   :  { %v776_v44 = vpop.eup %775 }
 0x2db   :  { %v494_v47 = vsel %vm493_vm8, %v774_v35, %v490_v43  ;;  %v635_v48 = vmul.f32 %v776_v44, %v633_v38  ;;  %vm640_vm13 = vweird.f32 %v776_v44 }
 0x2dc   :  { %v499_v6 = vsel %vm496_vm9, %v498_v45, %v494_v47  ;;  %vm641_vm15 = vmor %vm639_vm14, %vm640_vm13 }
 0x2dd   :  { %v500_v51 = vmul.f32 %v978_v24, %v499_v6  ;;  %v636_v52 = vsub.f32 1.0, %v635_v48  ;;  %v643_v24 = vand.u32 2147483647, %v633_v38 }
 0x2de   :  { %v503_v53 = vpop.permute.xlu0 %502 }
 0x2df   :  { %v637_v55 = vmul.f32 %v776_v44, %v636_v52  ;;  %v508_v56 = vsel %vm140_vm2, %v503_v53, 0  ;;  %v501_v59 = vpack.c.bf16 %v500_v51, %v500_v51  ;;  %vm644_vm0 = vcmp.eq.f32.partialorder %v643_v24, 8.507059e+37 }
 0x2e0   :  { %517 = vmatpush.bf16.msrb.mxu2 %v508_v56 }
 0x2e1   :  { %v638_v61 = vadd.f32 %v776_v44, %v637_v55 }
 0x2e3   :  { %720 = vmatmul.msk.bf16.vlgmr.msrb.gmra.mxu2 %vm90_vm1, %v501_v59  ;;  %v642_v1 = vsel %vm641_vm15, %v776_v44, %v638_v61 }
 0x2e4   :  { %v647_v8 = vsel %vm644_vm0, %v646_v4, %v642_v1 }
 0x2e5   :  { %v559_v58 = vpop.xlane.xlu1 %558  ;;  %v648_v10 = vmul.f32 %v982_v27, %v647_v8 }
 0x2e6   :  { %777 = vrcp.f32 %v559_v58  ;;  %v432_v0 = vpop.permute.xlu0 %431  ;;  %v571_v16 = vand.u32 2147483648, %v559_v58  ;;  %v569_v18 = vand.u32 2147483647, %v559_v58  ;;  %vm565_vm4 = vweird.f32 %v559_v58 }
 0x2e7   :  { %v437_v3 = vsel %vm140_vm2, %v432_v0, 0  ;;  %v649_v2 = vpack.c.bf16 %v648_v10, %v648_v10 }
 0x2e8   :  { %446 = vmatpush.bf16.msra.mxu1 %v437_v3  ;;  %v572_v20 = vor.u32 1.1754944e-38, %v571_v16  ;;  %vm570_vm6 = vcmp.eq.f32.partialorder %v569_v18, 8.507059e+37 }
 0x2eb   :  { %718 = vmatmul.msk.bf16.vlgmr.msra.gmra.mxu1 %vm90_vm1, %v430_v7 }
 0x2ec   :  { %v778_v9 = vpop.eup %777 }
 0x2ed   :  { %v561_v12 = vmul.f32 %v778_v9, %v559_v58  ;;  %vm566_vm3 = vweird.f32 %v778_v9 }
 0x2ee   :  { %v651_v11 = vpop.permute.xlu0 %650  ;;  %vm567_vm5 = vmor %vm565_vm4, %vm566_vm3 }
 0x2ef   :  { %v562_v13 = vsub.f32 1.0, %v561_v12  ;;  %v656_v14 = vsel %vm140_vm2, %v651_v11, 0 }
 0x2f0   :  { %665 = vmatpush.bf16.msra.mxu2 %v656_v14 }
 0x2f1   :  { %v563_v17 = vmul.f32 %v778_v9, %v562_v13 }
 0x2f3   :  { %v564_v19 = vadd.f32 %v778_v9, %v563_v17  ;;  %724 = vmatmul.msk.bf16.vlgmr.msra.gmra.mxu2 %vm90_vm1, %v649_v2 }
 0x2f5   :  { %v568_v21 = vsel %vm567_vm5, %v778_v9, %v564_v19 }
 0x2f6   :  { %v573_v27 = vsel %vm570_vm6, %v572_v20, %v568_v21  ;;  %v577_v22 = vpop.permute.xlu0 %576 }
 0x2f7   :  { %v574_v23 = vmul.f32 %v989_v32, %v573_v27  ;;  %v582_v25 = vsel %vm140_vm2, %v577_v22, 0  ;;  %vm231_vm2 = vcmask 130112  }
 0x2f8   :  { %591 = vmatpush.bf16.msrb.mxu1 %v582_v25 }
 0x2f9   :  { %v575_v26 = vpack.c.bf16 %v574_v23, %v574_v23 }
 0x2fb   :  { %722 = vmatmul.msk.bf16.vlgmr.msrb.gmra.mxu1 %vm90_vm1, %v575_v26 }
 0x31b   :  { %v153_v28 = vpop.f32.mrf.mxu2 }
 0x31c   :  { %157 = vst.msk [vmem:[#allocation7] sm:$0xff] %vm90_vm1, %v153_v28 }
 0x31d   :  { %v298_v29 = vpop.f32.mrf.mxu1 }
 0x31e   :  { %303 = vrot.lane.b32.xlu1 %v298_v29, %s871_s29 }
 0x323   :  { %v155_v30 = vpop.f32.mrf.mxu2 }
 0x325   :  { %v300_v5 = vpop.f32.mrf.mxu1 }
 0x32b   :  { %v223_v31 = vpop.f32.mrf.mxu2 }
 0x32c   :  { %228 = vrot.lane.b32.xlu2 %v223_v31, %s872_s30 }
 0x333   :  { %v225_v33 = vpop.f32.mrf.mxu2 }
 0x33b   :  { %v373_v32 = vpop.f32.mrf.mxu2 }
 0x343   :  { %v375_v34 = vpop.f32.mrf.mxu2 }
 0x366   :  { %v519_v35 = vpop.f32.mrf.mxu2 }
 0x368   :  { %v448_v36 = vpop.f32.mrf.mxu1 }
 0x369   :  { %453 = vst.msk [vmem:[#allocation7 + $0x8] sm:$0xff] %vm90_vm1, %v448_v36  ;;  %vm381_vm1 = vcmask 261312  }
 0x36e   :  { %v521_v37 = vpop.f32.mrf.mxu2 }
 0x370   :  { %v450_v38 = vpop.f32.mrf.mxu1 }
 0x376   :  { %v667_v39 = vpop.f32.mrf.mxu2 }
 0x377   :  { %672 = vrot.lane.b32.xlu2 %v667_v39, %s873_s3 }
 0x378   :  { %v593_v40 = vpop.f32.mrf.mxu1 }
 0x379   :  { %598 = vrot.lane.b32.xlu0 %v593_v40, %s871_s29 }
 0x37e   :  { %v669_v41 = vpop.f32.mrf.mxu2 }
 0x380   :  { %v595_v42 = vpop.f32.mrf.mxu1 }
 0x381   :  { %524 = vrot.lane.b32.xlu0 %v519_v35, %s872_s30 }
 0x386   :  { %v229_v15 = vpop.permute.xlu2 %228 }
 0x387   :  { %232 = vst.msk [vmem:[#allocation7] sm:$0xff] %vm231_vm2, %v229_v15 }
 0x389   :  { %378 = vrot.lane.b32.xlu0 %v373_v32, %s873_s3 }
 0x390   :  { %v304_v43 = vpop.permute.xlu1 %303 }
 0x391   :  { %307 = vst.msk [vmem:[#allocation7] sm:$0xff] %vm306_vm7, %v304_v43 }
 0x3d1   :  { %v673_v46 = vpop.permute.xlu2 %672 }
 0x3eb   :  { %v599_v44 = vpop.permute.xlu0 %598 }
 0x3f3   :  { %v525_v45 = vpop.permute.xlu0 %524 }
 0x3f4   :  { %527 = vst.msk [vmem:[#allocation7 + $0x8] sm:$0xff] %vm231_vm2, %v525_v45 }
 0x3f5   :  { %601 = vst.msk [vmem:[#allocation7 + $0x8] sm:$0xff] %vm306_vm7, %v599_v44 }
 0x3f6   :  { %675 = vst.msk [vmem:[#allocation7 + $0x8] sm:$0xff] %vm381_vm1, %v673_v46 }
 0x3fb   :  { %v379_v47 = vpop.permute.xlu0 %378 }
 0x3fc   :  { %382 = vst.msk [vmem:[#allocation7] sm:$0xff] %vm381_vm1, %v379_v47 }
 0x3fd   :  { %688 = dma.vmem_to_hbm [thread:$0]  %s681_s8, 256, %s683_s6, [#allocation4], %s875_s9, %s875_s9, %s872_s30  }
 0x3fe   :  { %855 = dma.done.wait [#allocation4], 256  }
 0x3ff   :  { %856 = vsyncadd [#allocation4], 4294967040 }
 0x400   :  { %693 = vsyncpa [#allocation3], 1 }
 0x401   :  { %694 = vsyncpa [#allocation6], 1 }
 0x402   :  { %695 = vsyncpa [#allocation4], 1 }

</bundles_post_ra>
